<compile_context>
chip_gen: v7x
topology: tpu7x:2x2x1
jax: 0.10.0
libtpu: 0.0.40
codegen_flags: <defaults>
</compile_context>

<pallas_src>
import functools
import math

import jax
import jax.numpy as jnp
from jax import lax
from jax.experimental import pallas as pl
from jax.experimental.pallas import tpu as pltpu


def _round_up(n, m):
    return ((n + m - 1) // m) * m


def _cdiv(a, b):
    return (a + b - 1) // b


def _mlp_head_kernel(x_ref, g_ref, be_ref, w1_ref, b1_ref, w2_ref, b2_ref, o_ref,
                     *, eps, inv_d, matmul_dtype):
    # x_ref: (TILE_M, D) streamed; all weight/bias refs resident across grid steps.
    x = x_ref[...].astype(jnp.float32)

    # Fused single-pass LayerNorm statistics over the true (unpadded) D.
    s1 = jnp.sum(x, axis=-1, keepdims=True)
    s2 = jnp.sum(x * x, axis=-1, keepdims=True)
    mean = s1 * inv_d
    var = jnp.maximum(s2 * inv_d - mean * mean, 0.0)
    y = (x - mean) * lax.rsqrt(var + eps)
    y = y * g_ref[...] + be_ref[...]                      # affine params kept in f32

    # Linear1 + ReLU (hidden lanes padded to a multiple of 128; padding cols are 0).
    h = jnp.dot(y.astype(matmul_dtype), w1_ref[...],
                preferred_element_type=jnp.float32) + b1_ref[...]
    h = jnp.maximum(h, 0.0)

    # Linear2 (class lanes padded to a multiple of 128 -> lane-dense store).
    o = jnp.dot(h.astype(matmul_dtype), w2_ref[...],
                preferred_element_type=jnp.float32) + b2_ref[...]
    o_ref[...] = o.astype(o_ref.dtype)


def prepare_mlp_head_params(gamma, beta, w1, b1, w2, b2, *,
                            matmul_dtype=jnp.bfloat16):
    """One-time weight prep (padding / transpose) hoisted out of the forward path.

    gamma, beta: (D,)        LayerNorm affine (kept f32)
    w1: (H, D), b1: (H,)     torch nn.Linear layout (out, in)
    w2: (C, H), b2: (C,)
    """
    D = gamma.shape[0]
    H = w1.shape[0]
    C = w2.shape[0]
    Hp = _round_up(H, 128)
    Cp = _round_up(C, 128)

    # Matmul operands in the (possibly narrow) MXU dtype; zero padding => exact.
    w1_p = jnp.zeros((D, Hp), matmul_dtype).at[:, :H].set(w1.T.astype(matmul_dtype))
    w2_p = jnp.zeros((Hp, Cp), matmul_dtype).at[:H, :C].set(w2.T.astype(matmul_dtype))
    # LayerNorm affine params and biases stay f32 (kernel accumulates in f32).
    b1_p = jnp.zeros((1, Hp), jnp.float32).at[:, :H].set(b1.astype(jnp.float32))
    b2_p = jnp.zeros((1, Cp), jnp.float32).at[:, :C].set(b2.astype(jnp.float32))
    g2 = gamma.reshape(1, D).astype(jnp.float32)
    be2 = beta.reshape(1, D).astype(jnp.float32)

    return dict(gamma=g2, beta=be2, w1=w1_p, b1=b1_p, w2=w2_p, b2=b2_p,
                num_classes=C, matmul_dtype=matmul_dtype)


def mlp_head_forward(x, params, *, eps=1e-5, tile_m=512):
    """x: (..., D) -> (..., num_classes), fully fused in one pallas_call."""
    g2, be2 = params["gamma"], params["beta"]
    w1_p, b1_p = params["w1"], params["b1"]
    w2_p, b2_p = params["w2"], params["b2"]
    C = params["num_classes"]
    matmul_dtype = params["matmul_dtype"]

    orig_shape = x.shape
    D = orig_shape[-1]
    Hp = w1_p.shape[1]
    Cp = w2_p.shape[1]
    M = math.prod(orig_shape[:-1])
    x2 = x.reshape(M, D)
    out_dtype = x.dtype

    ROW_ALIGN = 16  # bf16 sublane tile (also a multiple of the f32 tile of 8)
    xb = jnp.dtype(x.dtype).itemsize
    ob = jnp.dtype(out_dtype).itemsize
    wb = jnp.dtype(matmul_dtype).itemsize

    # --- choose TILE_M from a VMEM budget (headroom on v7x's 64 MiB/TC) ---------
    VMEM_BUDGET = 48 << 20
    resident = 2 * ((D * Hp + Hp * Cp) * wb + (Hp + Cp) * 4 + 2 * D * 4)
    per_row = 2 * (D * xb + Cp * ob)          # double-buffered x stream + out stream
    avail = VMEM_BUDGET - resident - (4 << 20)
    tm_cap = max(ROW_ALIGN, avail // per_row) if avail > 0 else ROW_ALIGN
    # TODO(synk): if `resident` alone exceeds the budget (very large D), tile the
    # contraction dim too instead of only shrinking TILE_M.
    tm = min(int(tile_m), int(tm_cap), _round_up(M, ROW_ALIGN))
    tm = max(ROW_ALIGN, (tm // ROW_ALIGN) * ROW_ALIGN)
    if _cdiv(M, tm) < 2 and M >= 2 * ROW_ALIGN:
        # v7x has 2 TensorCores; keep >= 2 blocks on the parallel row axis.
        tm = _round_up(_cdiv(M, 2), ROW_ALIGN)
    num_blocks = _cdiv(M, tm)

    flops = 2 * M * (D * Hp + Hp * Cp) + 10 * M * D
    bytes_accessed = (M * D * xb + M * Cp * ob
                      + (D * Hp + Hp * Cp) * wb + (Hp + Cp) * 4 + 2 * D * 4)

    kernel = functools.partial(_mlp_head_kernel, eps=float(eps), inv_d=1.0 / D,
                               matmul_dtype=matmul_dtype)

    def _resident_spec(shape, mode):
        if mode is None:
            return pl.BlockSpec(shape, lambda i: (0, 0))
        return pl.BlockSpec(shape, lambda i: (0, 0), pipeline_mode=mode)

    def _call(weight_mode):
        grid_spec = pltpu.PrefetchScalarGridSpec(
            num_scalar_prefetch=0,
            grid=(num_blocks,),
            in_specs=[
                pl.BlockSpec((tm, D), lambda i: (i, 0)),       # x (streamed)
                _resident_spec((1, D), weight_mode),           # gamma
                _resident_spec((1, D), weight_mode),           # beta
                _resident_spec((D, Hp), weight_mode),          # w1
                _resident_spec((1, Hp), weight_mode),          # b1
                _resident_spec((Hp, Cp), weight_mode),         # w2
                _resident_spec((1, Cp), weight_mode),          # b2
            ],
            out_specs=pl.BlockSpec((tm, Cp), lambda i: (i, 0)),
        )
        return pl.pallas_call(
            kernel,
            out_shape=jax.ShapeDtypeStruct((M, Cp), out_dtype),
            grid_spec=grid_spec,
            compiler_params=pltpu.CompilerParams(
                dimension_semantics=("parallel",),
                vmem_limit_bytes=VMEM_BUDGET,
            ),
            cost_estimate=pl.CostEstimate(
                flops=flops, transcendentals=M, bytes_accessed=bytes_accessed),
        )(x2, g2, be2, w1_p, b1_p, w2_p, b2_p)

    try:
        # Resident operands never change block index -> single-buffer them.
        out = _call(pl.Buffered(buffer_count=1))
    except Exception:
        # Fallback for JAX builds that reject single-buffered pipeline_mode.
        out = _call(None)

    return out[:, :C].reshape(orig_shape[:-1] + (C,))


def _mlp_head_ref(x, gamma, beta, w1, b1, w2, b2, eps=1e-5):
    mean = jnp.mean(x, axis=-1, keepdims=True)
    var = jnp.mean((x - mean) ** 2, axis=-1, keepdims=True)
    y = (x - mean) * lax.rsqrt(var + eps) * gamma + beta
    h = jnp.maximum(y @ w1.T + b1, 0.0)
    return h @ w2.T + b2


if __name__ == "__main__":
    # tokens x = (batch=2, seq=8, dim_embedding=32), num_classes=10
    B, S, D = 2, 8, 32
    H = D // 2
    C = 10

    key = jax.random.PRNGKey(0)
    kx, kg, kb, kw1, kb1, kw2, kb2 = jax.random.split(key, 7)

    x = jax.random.normal(kx, (B, S, D), dtype=jnp.float32)
    gamma = 1.0 + 0.05 * jax.random.normal(kg, (D,), dtype=jnp.float32)
    beta = 0.05 * jax.random.normal(kb, (D,), dtype=jnp.float32)
    w1 = 0.1 * jax.random.normal(kw1, (H, D), dtype=jnp.float32)   # torch Linear (out, in)
    b1 = 0.05 * jax.random.normal(kb1, (H,), dtype=jnp.float32)
    w2 = 0.1 * jax.random.normal(kw2, (C, H), dtype=jnp.float32)
    b2 = 0.05 * jax.random.normal(kb2, (C,), dtype=jnp.float32)

    ref = _mlp_head_ref(x, gamma, beta, w1, b1, w2, b2)

    # Default bf16-MXU path (weights/matmul operands bf16, f32 accumulation).
    params_bf16 = prepare_mlp_head_params(gamma, beta, w1, b1, w2, b2)
    out_bf16 = jax.block_until_ready(mlp_head_forward(x, params_bf16))
    assert out_bf16.shape == (B, S, C), out_bf16.shape
    assert jnp.allclose(out_bf16, ref, atol=3e-2, rtol=3e-2), "bf16 path mismatch"

    # Full-f32 path for a tight numerical check of the fused kernel.
    params_f32 = prepare_mlp_head_params(gamma, beta, w1, b1, w2, b2,
                                         matmul_dtype=jnp.float32)
    out_f32 = jax.block_until_ready(mlp_head_forward(x, params_f32))
    assert out_f32.shape == (B, S, C), out_f32.shape
    assert jnp.allclose(out_f32, ref, atol=2e-4, rtol=2e-4), "f32 path mismatch"

    print("KERNEL_OK")
</pallas_src>

<mosaic_0001>
module attributes {stable_mosaic.version = 11 : i64} {
  func.func @_mlp_head_kernel(%arg0: i32, %arg1: memref<16x32xf32, #tpu.memory_space<vmem>>, %arg2: memref<1x32xf32, #tpu.memory_space<vmem>>, %arg3: memref<1x32xf32, #tpu.memory_space<vmem>>, %arg4: memref<32x128xbf16, #tpu.memory_space<vmem>>, %arg5: memref<1x128xf32, #tpu.memory_space<vmem>>, %arg6: memref<128x128xbf16, #tpu.memory_space<vmem>>, %arg7: memref<1x128xf32, #tpu.memory_space<vmem>>, %arg8: memref<16x128xf32, #tpu.memory_space<vmem>>) attributes {dimension_semantics = [#tpu.dimension_semantics<parallel>], iteration_bounds = array<i64: 1>, scalar_prefetch = 0 : i64, scratch_operands = 0 : i64, tpu.core_type = #tpu.core_type<tc>, window_params = [{transform_indices = @transform_0, window_bounds = array<i64: 16, 32>}, {pipeline_mode = #tpu.pipeline_mode<synchronous>, transform_indices = @transform_1, window_bounds = array<i64: 1, 32>}, {pipeline_mode = #tpu.pipeline_mode<synchronous>, transform_indices = @transform_2, window_bounds = array<i64: 1, 32>}, {pipeline_mode = #tpu.pipeline_mode<synchronous>, transform_indices = @transform_3, window_bounds = array<i64: 32, 128>}, {pipeline_mode = #tpu.pipeline_mode<synchronous>, transform_indices = @transform_4, window_bounds = array<i64: 1, 128>}, {pipeline_mode = #tpu.pipeline_mode<synchronous>, transform_indices = @transform_5, window_bounds = array<i64: 128, 128>}, {pipeline_mode = #tpu.pipeline_mode<synchronous>, transform_indices = @transform_6, window_bounds = array<i64: 1, 128>}, {transform_indices = @transform_7, window_bounds = array<i64: 16, 128>}]} {
    %c0 = arith.constant 0 : index
    %c0_0 = arith.constant 0 : index
    %0 = vector.load %arg1[%c0, %c0_0] : memref<16x32xf32, #tpu.memory_space<vmem>>, vector<16x32xf32>
    %cst = arith.constant dense<0.000000e+00> : vector<16xf32>
    %1 = vector.multi_reduction <add>, %0, %cst [1] : vector<16x32xf32> to vector<16xf32>
    %2 = vector.shape_cast %1 : vector<16xf32> to vector<16x1xf32>
    %3 = arith.mulf %0, %0 : vector<16x32xf32>
    %cst_1 = arith.constant dense<0.000000e+00> : vector<16xf32>
    %4 = vector.multi_reduction <add>, %3, %cst_1 [1] : vector<16x32xf32> to vector<16xf32>
    %5 = vector.shape_cast %4 : vector<16xf32> to vector<16x1xf32>
    %cst_2 = arith.constant 3.125000e-02 : f32
    %6 = vector.broadcast %cst_2 : f32 to vector<16x1xf32>
    %7 = arith.mulf %2, %6 : vector<16x1xf32>
    %cst_3 = arith.constant 3.125000e-02 : f32
    %8 = vector.broadcast %cst_3 : f32 to vector<16x1xf32>
    %9 = arith.mulf %5, %8 : vector<16x1xf32>
    %10 = arith.mulf %7, %7 : vector<16x1xf32>
    %11 = arith.subf %9, %10 : vector<16x1xf32>
    %cst_4 = arith.constant 0.000000e+00 : f32
    %12 = vector.broadcast %cst_4 : f32 to vector<16x1xf32>
    %13 = arith.maximumf %11, %12 : vector<16x1xf32>
    %14 = vector.broadcast %7 : vector<16x1xf32> to vector<16x32xf32>
    %15 = arith.subf %0, %14 : vector<16x32xf32>
    %cst_5 = arith.constant 9.99999974E-6 : f32
    %16 = vector.broadcast %cst_5 : f32 to vector<16x1xf32>
    %17 = arith.addf %13, %16 : vector<16x1xf32>
    %18 = math.rsqrt %17 : vector<16x1xf32>
    %19 = vector.broadcast %18 : vector<16x1xf32> to vector<16x32xf32>
    %20 = arith.mulf %15, %19 : vector<16x32xf32>
    %c0_6 = arith.constant 0 : index
    %c0_7 = arith.constant 0 : index
    %21 = vector.load %arg2[%c0_6, %c0_7] : memref<1x32xf32, #tpu.memory_space<vmem>>, vector<1x32xf32>
    %22 = vector.broadcast %21 : vector<1x32xf32> to vector<16x32xf32>
    %23 = arith.mulf %20, %22 : vector<16x32xf32>
    %c0_8 = arith.constant 0 : index
    %c0_9 = arith.constant 0 : index
    %24 = vector.load %arg3[%c0_8, %c0_9] : memref<1x32xf32, #tpu.memory_space<vmem>>, vector<1x32xf32>
    %25 = vector.broadcast %24 : vector<1x32xf32> to vector<16x32xf32>
    %26 = arith.addf %23, %25 : vector<16x32xf32>
    %27 = arith.truncf %26 : vector<16x32xf32> to vector<16x32xbf16>
    %c0_10 = arith.constant 0 : index
    %c0_11 = arith.constant 0 : index
    %28 = vector.load %arg4[%c0_10, %c0_11] : memref<32x128xbf16, #tpu.memory_space<vmem>>, vector<32x128xbf16>
    %cst_12 = arith.constant dense<0.000000e+00> : vector<16x128xf32>
    %29 = tpu.matmul %27, %28, %cst_12 {dimension_numbers = #tpu.dot_dimension_numbers<[1], [0], [0], [1], [0, 0, 1, 1], [], []>} : vector<16x32xbf16>, vector<32x128xbf16>, vector<16x128xf32> -> vector<16x128xf32>
    %c0_13 = arith.constant 0 : index
    %c0_14 = arith.constant 0 : index
    %30 = vector.load %arg5[%c0_13, %c0_14] : memref<1x128xf32, #tpu.memory_space<vmem>>, vector<1x128xf32>
    %31 = vector.broadcast %30 : vector<1x128xf32> to vector<16x128xf32>
    %32 = arith.addf %29, %31 : vector<16x128xf32>
    %cst_15 = arith.constant 0.000000e+00 : f32
    %33 = vector.broadcast %cst_15 : f32 to vector<16x128xf32>
    %34 = arith.maximumf %32, %33 : vector<16x128xf32>
    %35 = arith.truncf %34 : vector<16x128xf32> to vector<16x128xbf16>
    %c0_16 = arith.constant 0 : index
    %c0_17 = arith.constant 0 : index
    %36 = vector.load %arg6[%c0_16, %c0_17] : memref<128x128xbf16, #tpu.memory_space<vmem>>, vector<128x128xbf16>
    %cst_18 = arith.constant dense<0.000000e+00> : vector<16x128xf32>
    %37 = tpu.matmul %35, %36, %cst_18 {dimension_numbers = #tpu.dot_dimension_numbers<[1], [0], [0], [1], [0, 0, 1, 1], [], []>} : vector<16x128xbf16>, vector<128x128xbf16>, vector<16x128xf32> -> vector<16x128xf32>
    %c0_19 = arith.constant 0 : index
    %c0_20 = arith.constant 0 : index
    %38 = vector.load %arg7[%c0_19, %c0_20] : memref<1x128xf32, #tpu.memory_space<vmem>>, vector<1x128xf32>
    %39 = vector.broadcast %38 : vector<1x128xf32> to vector<16x128xf32>
    %40 = arith.addf %37, %39 : vector<16x128xf32>
    %c0_21 = arith.constant 0 : index
    %c0_22 = arith.constant 0 : index
    %41 = vector.load %arg8[%c0_21, %c0_22] : memref<16x128xf32, #tpu.memory_space<vmem>>, vector<16x128xf32>
    tpu.vector_store %arg8[%c0_21, %c0_22], %40 {strides = array<i32>} : memref<16x128xf32, #tpu.memory_space<vmem>>, vector<16x128xf32>,
    return
  }
  func.func @transform_0(%arg0: i32) -> (i32, i32) {
    %c0_i32 = arith.constant 0 : i32
    %c0_i32_0 = arith.constant 0 : i32
    return %arg0, %c0_i32 : i32, i32
  }
  func.func @transform_1(%arg0: i32) -> (i32, i32) {
    %c0_i32 = arith.constant 0 : i32
    %c0_i32_0 = arith.constant 0 : i32
    %c0_i32_1 = arith.constant 0 : i32
    return %c0_i32, %c0_i32_0 : i32, i32
  }
  func.func @transform_2(%arg0: i32) -> (i32, i32) {
    %c0_i32 = arith.constant 0 : i32
    %c0_i32_0 = arith.constant 0 : i32
    %c0_i32_1 = arith.constant 0 : i32
    return %c0_i32, %c0_i32_0 : i32, i32
  }
  func.func @transform_3(%arg0: i32) -> (i32, i32) {
    %c0_i32 = arith.constant 0 : i32
    %c0_i32_0 = arith.constant 0 : i32
    %c0_i32_1 = arith.constant 0 : i32
    return %c0_i32, %c0_i32_0 : i32, i32
  }
  func.func @transform_4(%arg0: i32) -> (i32, i32) {
    %c0_i32 = arith.constant 0 : i32
    %c0_i32_0 = arith.constant 0 : i32
    %c0_i32_1 = arith.constant 0 : i32
    return %c0_i32, %c0_i32_0 : i32, i32
  }
  func.func @transform_5(%arg0: i32) -> (i32, i32) {
    %c0_i32 = arith.constant 0 : i32
    %c0_i32_0 = arith.constant 0 : i32
    %c0_i32_1 = arith.constant 0 : i32
    return %c0_i32, %c0_i32_0 : i32, i32
  }
  func.func @transform_6(%arg0: i32) -> (i32, i32) {
    %c0_i32 = arith.constant 0 : i32
    %c0_i32_0 = arith.constant 0 : i32
    %c0_i32_1 = arith.constant 0 : i32
    return %c0_i32, %c0_i32_0 : i32, i32
  }
  func.func @transform_7(%arg0: i32) -> (i32, i32) {
    %c0_i32 = arith.constant 0 : i32
    %c0_i32_0 = arith.constant 0 : i32
    return %arg0, %c0_i32 : i32, i32
  }
}

module attributes {stable_mosaic.version = 11 : i64} {
  func.func @_mlp_head_kernel(%arg0: i32, %arg1: memref<16x32xf32, #tpu.memory_space<vmem>>, %arg2: memref<1x32xf32, #tpu.memory_space<vmem>>, %arg3: memref<1x32xf32, #tpu.memory_space<vmem>>, %arg4: memref<32x128xbf16, #tpu.memory_space<vmem>>, %arg5: memref<1x128xf32, #tpu.memory_space<vmem>>, %arg6: memref<128x128xbf16, #tpu.memory_space<vmem>>, %arg7: memref<1x128xf32, #tpu.memory_space<vmem>>, %arg8: memref<16x128xf32, #tpu.memory_space<vmem>>) attributes {dimension_semantics = [#tpu.dimension_semantics<parallel>], iteration_bounds = array<i64: 1>, scalar_prefetch = 0 : i64, scratch_operands = 0 : i64, tpu.core_type = #tpu.core_type<tc>, window_params = [{transform_indices = @transform_0, window_bounds = array<i64: 16, 32>}, {pipeline_mode = #tpu.pipeline_mode<synchronous>, transform_indices = @transform_1, window_bounds = array<i64: 1, 32>}, {pipeline_mode = #tpu.pipeline_mode<synchronous>, transform_indices = @transform_2, window_bounds = array<i64: 1, 32>}, {pipeline_mode = #tpu.pipeline_mode<synchronous>, transform_indices = @transform_3, window_bounds = array<i64: 32, 128>}, {pipeline_mode = #tpu.pipeline_mode<synchronous>, transform_indices = @transform_4, window_bounds = array<i64: 1, 128>}, {pipeline_mode = #tpu.pipeline_mode<synchronous>, transform_indices = @transform_5, window_bounds = array<i64: 128, 128>}, {pipeline_mode = #tpu.pipeline_mode<synchronous>, transform_indices = @transform_6, window_bounds = array<i64: 1, 128>}, {transform_indices = @transform_7, window_bounds = array<i64: 16, 128>}]} {
    %c0 = arith.constant 0 : index
    %c0_0 = arith.constant 0 : index
    %0 = vector.load %arg1[%c0, %c0_0] : memref<16x32xf32, #tpu.memory_space<vmem>>, vector<16x32xf32>
    %cst = arith.constant dense<0.000000e+00> : vector<16xf32>
    %1 = vector.multi_reduction <add>, %0, %cst [1] : vector<16x32xf32> to vector<16xf32>
    %2 = vector.shape_cast %1 : vector<16xf32> to vector<16x1xf32>
    %3 = arith.mulf %0, %0 : vector<16x32xf32>
    %cst_1 = arith.constant dense<0.000000e+00> : vector<16xf32>
    %4 = vector.multi_reduction <add>, %3, %cst_1 [1] : vector<16x32xf32> to vector<16xf32>
    %5 = vector.shape_cast %4 : vector<16xf32> to vector<16x1xf32>
    %cst_2 = arith.constant 3.125000e-02 : f32
    %6 = vector.broadcast %cst_2 : f32 to vector<16x1xf32>
    %7 = arith.mulf %2, %6 : vector<16x1xf32>
    %cst_3 = arith.constant 3.125000e-02 : f32
    %8 = vector.broadcast %cst_3 : f32 to vector<16x1xf32>
    %9 = arith.mulf %5, %8 : vector<16x1xf32>
    %10 = arith.mulf %7, %7 : vector<16x1xf32>
    %11 = arith.subf %9, %10 : vector<16x1xf32>
    %cst_4 = arith.constant 0.000000e+00 : f32
    %12 = vector.broadcast %cst_4 : f32 to vector<16x1xf32>
    %13 = arith.maximumf %11, %12 : vector<16x1xf32>
    %14 = vector.broadcast %7 : vector<16x1xf32> to vector<16x32xf32>
    %15 = arith.subf %0, %14 : vector<16x32xf32>
    %cst_5 = arith.constant 9.99999974E-6 : f32
    %16 = vector.broadcast %cst_5 : f32 to vector<16x1xf32>
    %17 = arith.addf %13, %16 : vector<16x1xf32>
    %18 = math.rsqrt %17 : vector<16x1xf32>
    %19 = vector.broadcast %18 : vector<16x1xf32> to vector<16x32xf32>
    %20 = arith.mulf %15, %19 : vector<16x32xf32>
    %c0_6 = arith.constant 0 : index
    %c0_7 = arith.constant 0 : index
    %21 = vector.load %arg2[%c0_6, %c0_7] : memref<1x32xf32, #tpu.memory_space<vmem>>, vector<1x32xf32>
    %22 = vector.broadcast %21 : vector<1x32xf32> to vector<16x32xf32>
    %23 = arith.mulf %20, %22 : vector<16x32xf32>
    %c0_8 = arith.constant 0 : index
    %c0_9 = arith.constant 0 : index
    %24 = vector.load %arg3[%c0_8, %c0_9] : memref<1x32xf32, #tpu.memory_space<vmem>>, vector<1x32xf32>
    %25 = vector.broadcast %24 : vector<1x32xf32> to vector<16x32xf32>
    %26 = arith.addf %23, %25 : vector<16x32xf32>
    %27 = arith.truncf %26 : vector<16x32xf32> to vector<16x32xbf16>
    %c0_10 = arith.constant 0 : index
    %c0_11 = arith.constant 0 : index
    %28 = vector.load %arg4[%c0_10, %c0_11] : memref<32x128xbf16, #tpu.memory_space<vmem>>, vector<32x128xbf16>
    %cst_12 = arith.constant dense<0.000000e+00> : vector<16x128xf32>
    %29 = tpu.matmul %27, %28, %cst_12 {dimension_numbers = #tpu.dot_dimension_numbers<[1], [0], [0], [1], [0, 0, 1, 1], [], []>} : vector<16x32xbf16>, vector<32x128xbf16>, vector<16x128xf32> -> vector<16x128xf32>
    %c0_13 = arith.constant 0 : index
    %c0_14 = arith.constant 0 : index
    %30 = vector.load %arg5[%c0_13, %c0_14] : memref<1x128xf32, #tpu.memory_space<vmem>>, vector<1x128xf32>
    %31 = vector.broadcast %30 : vector<1x128xf32> to vector<16x128xf32>
    %32 = arith.addf %29, %31 : vector<16x128xf32>
    %cst_15 = arith.constant 0.000000e+00 : f32
    %33 = vector.broadcast %cst_15 : f32 to vector<16x128xf32>
    %34 = arith.maximumf %32, %33 : vector<16x128xf32>
    %35 = arith.truncf %34 : vector<16x128xf32> to vector<16x128xbf16>
    %c0_16 = arith.constant 0 : index
    %c0_17 = arith.constant 0 : index
    %36 = vector.load %arg6[%c0_16, %c0_17] : memref<128x128xbf16, #tpu.memory_space<vmem>>, vector<128x128xbf16>
    %cst_18 = arith.constant dense<0.000000e+00> : vector<16x128xf32>
    %37 = tpu.matmul %35, %36, %cst_18 {dimension_numbers = #tpu.dot_dimension_numbers<[1], [0], [0], [1], [0, 0, 1, 1], [], []>} : vector<16x128xbf16>, vector<128x128xbf16>, vector<16x128xf32> -> vector<16x128xf32>
    %c0_19 = arith.constant 0 : index
    %c0_20 = arith.constant 0 : index
    %38 = vector.load %arg7[%c0_19, %c0_20] : memref<1x128xf32, #tpu.memory_space<vmem>>, vector<1x128xf32>
    %39 = vector.broadcast %38 : vector<1x128xf32> to vector<16x128xf32>
    %40 = arith.addf %37, %39 : vector<16x128xf32>
    %c0_21 = arith.constant 0 : index
    %c0_22 = arith.constant 0 : index
    %41 = vector.load %arg8[%c0_21, %c0_22] : memref<16x128xf32, #tpu.memory_space<vmem>>, vector<16x128xf32>
    tpu.vector_store %arg8[%c0_21, %c0_22], %40 {strides = array<i32>} : memref<16x128xf32, #tpu.memory_space<vmem>>, vector<16x128xf32>,
    return
  }
  func.func @transform_0(%arg0: i32) -> (i32, i32) {
    %c0_i32 = arith.constant 0 : i32
    %c0_i32_0 = arith.constant 0 : i32
    return %arg0, %c0_i32 : i32, i32
  }
  func.func @transform_1(%arg0: i32) -> (i32, i32) {
    %c0_i32 = arith.constant 0 : i32
    %c0_i32_0 = arith.constant 0 : i32
    %c0_i32_1 = arith.constant 0 : i32
    return %c0_i32, %c0_i32_0 : i32, i32
  }
  func.func @transform_2(%arg0: i32) -> (i32, i32) {
    %c0_i32 = arith.constant 0 : i32
    %c0_i32_0 = arith.constant 0 : i32
    %c0_i32_1 = arith.constant 0 : i32
    return %c0_i32, %c0_i32_0 : i32, i32
  }
  func.func @transform_3(%arg0: i32) -> (i32, i32) {
    %c0_i32 = arith.constant 0 : i32
    %c0_i32_0 = arith.constant 0 : i32
    %c0_i32_1 = arith.constant 0 : i32
    return %c0_i32, %c0_i32_0 : i32, i32
  }
  func.func @transform_4(%arg0: i32) -> (i32, i32) {
    %c0_i32 = arith.constant 0 : i32
    %c0_i32_0 = arith.constant 0 : i32
    %c0_i32_1 = arith.constant 0 : i32
    return %c0_i32, %c0_i32_0 : i32, i32
  }
  func.func @transform_5(%arg0: i32) -> (i32, i32) {
    %c0_i32 = arith.constant 0 : i32
    %c0_i32_0 = arith.constant 0 : i32
    %c0_i32_1 = arith.constant 0 : i32
    return %c0_i32, %c0_i32_0 : i32, i32
  }
  func.func @transform_6(%arg0: i32) -> (i32, i32) {
    %c0_i32 = arith.constant 0 : i32
    %c0_i32_0 = arith.constant 0 : i32
    %c0_i32_1 = arith.constant 0 : i32
    return %c0_i32, %c0_i32_0 : i32, i32
  }
  func.func @transform_7(%arg0: i32) -> (i32, i32) {
    %c0_i32 = arith.constant 0 : i32
    %c0_i32_0 = arith.constant 0 : i32
    return %arg0, %c0_i32 : i32, i32
  }
}

</mosaic_0001>

<bundles_post_ra>
// kernel: tpu_custom_call.1
= control target key start
LH: loop header
LB: loop body
LE: loop exit
PB: predicated region body
PF: predicated region fallthrough
CT: control target
= control target key end

     0   :  { %12 = vsyncpa [#allocation3], 0  ;;  %s631_s0 = inlined_call_operand.hbm [shape: f32[16,32], index: 0, kind: input, shape index: {}]   ;;  %s632_s1 = inlined_call_operand.vmem [shape: f32[1,32], index: 1, kind: input, shape index: {}]   ;;  %s633_s2 = inlined_call_operand.vmem [shape: f32[1,32], index: 2, kind: input, shape index: {}]   ;;  %s634_s3 = inlined_call_operand.hbm [shape: bf16[32,128], index: 3, kind: input, shape index: {}]   ;;  %s635_s4 = inlined_call_operand.vmem [shape: f32[1,128], index: 4, kind: input, shape index: {}]   ;;  %s636_s5 = inlined_call_operand.hbm [shape: bf16[128,128], index: 5, kind: input, shape index: {}]   ;;  %s637_s6 = inlined_call_operand.vmem [shape: f32[1,128], index: 6, kind: input, shape index: {}]   ;;  %s638_s7 = inlined_call_operand.hbm [shape: f32[16,128], index: 7, kind: output, shape index: {}]  }
   0x1   :  { %13 = vsyncpa [#allocation6], 0 }
   0x2   :  { %14 = vsyncpa [#allocation4], 0  ;;  %s498_s24 = smov [#allocation5]   ;;  %s404_s28 = scalar_lea.hbm %s634_s3, 256 }
   0x3   :  { %s36_s25 = sshll.u32 %s498_s24, 4  ;;  %p405_p0 = scmp.ne.s32.totalorder %s634_s3, %s404_s28  ;;  %s37_s25 = int_to_ptr.vmem [resolvable:$true] %s36_s25 }
   0x4   :  { %p408_p1 = scmp.lt.u32.totalorder %s404_s28, %s634_s3 }
   0x6   :  { %p410_p2 = pnand %p408_p1, %p405_p0 }
   0x8   :  { %413 = shalt.err (!%p410_p2)
}
   0x9   :  { %s414_s10 = scalar_lea.vmem %s37_s25, 256  ;;  %p419_p4 = scmp.lt.s32.totalorder %s37_s25, %s37_s25 }
   0xa   :  { %p415_p3 = scmp.ne.s32.totalorder %s37_s25, %s414_s10  ;;  %p420_p5 = scmp.lt.s32.totalorder %s414_s10, %s414_s10 }
   0xc   :  { %p421_p6 = por %p420_p5, %p419_p4 }
   0xe   :  { %p422_p7 = pnand %p421_p6, %p415_p3 }
  0x10   :  { %425 = shalt.err (!%p422_p7)
}
  0x11   :  { %s499_s11 = smov 64   ;;  %s500_s12 = smov 4  }
  0x12   :  { %42 = dma.hbm_to_vmem [thread:$0]  %s634_s3, 256, %s37_s25, [#allocation6], %s499_s11, %s499_s11, %s500_s12  }
  0x13   :  { %s501_s15 = smov [#allocation2]   ;;  %s426_s19 = scalar_lea.hbm %s631_s0, 256 }
  0x14   :  { %s20_s16 = sshll.u32 %s501_s15, 4  ;;  %p427_p8 = scmp.ne.s32.totalorder %s631_s0, %s426_s19  ;;  %s21_s16 = int_to_ptr.vmem [resolvable:$true] %s20_s16 }
  0x15   :  { %p430_p9 = scmp.lt.u32.totalorder %s426_s19, %s631_s0 }
  0x17   :  { %p432_p10 = pnand %p430_p9, %p427_p8 }
  0x19   :  { %435 = shalt.err (!%p432_p10)
}
  0x1a   :  { %s436_s24 = scalar_lea.vmem %s21_s16, 256  ;;  %p441_p12 = scmp.lt.s32.totalorder %s21_s16, %s21_s16 }
  0x1b   :  { %p437_p11 = scmp.ne.s32.totalorder %s21_s16, %s436_s24  ;;  %p442_p13 = scmp.lt.s32.totalorder %s436_s24, %s436_s24 }
  0x1d   :  { %p443_p0 = por %p442_p13, %p441_p12 }
  0x1f   :  { %p444_p1 = pnand %p443_p0, %p437_p11 }
  0x21   :  { %447 = shalt.err (!%p444_p1)
}
  0x22   :  { %s502_s3 = smov 128   ;;  %s503_s25 = smov 8  }
  0x23   :  { %26 = dma.hbm_to_vmem [thread:$0]  %s631_s0, 256, %s21_s16, [#allocation3], %s502_s3, %s502_s3, %s503_s25  }
  0x24   :  { %s504_s28 = smov [#allocation7]   ;;  %s448_s9 = scalar_lea.hbm %s636_s5, 1024 }
  0x25   :  { %s50_s29 = sshll.u32 %s504_s28, 4  ;;  %p449_p2 = scmp.ne.s32.totalorder %s636_s5, %s448_s9  ;;  %s51_s29 = int_to_ptr.vmem [resolvable:$true] %s50_s29 }
  0x26   :  { %p452_p3 = scmp.lt.u32.totalorder %s448_s9, %s636_s5 }
  0x28   :  { %p454_p4 = pnand %p452_p3, %p449_p2 }
  0x2a   :  { %457 = shalt.err (!%p454_p4)
}
  0x2b   :  { %s458_s17 = scalar_lea.vmem %s51_s29, 1024  ;;  %p463_p6 = scmp.lt.s32.totalorder %s51_s29, %s51_s29 }
  0x2c   :  { %p459_p5 = scmp.ne.s32.totalorder %s51_s29, %s458_s17  ;;  %p464_p7 = scmp.lt.s32.totalorder %s458_s17, %s458_s17 }
  0x2e   :  { %p465_p8 = por %p464_p7, %p463_p6 }
  0x30   :  { %p466_p9 = pnand %p465_p8, %p459_p5 }
  0x32   :  { %469 = shalt.err (!%p466_p9)
}
  0x33   :  { %56 = dma.hbm_to_vmem [thread:$0]  %s636_s5, 1024, %s51_s29, [#allocation6], %s499_s11, %s499_s11, %s500_s12  }
  0x34   :  { %492 = dma.done.wait [#allocation3], 256  }
  0x35   :  { %493 = vsyncadd [#allocation3], 4294967040 }
  0x36   :  { %494 = dma.done.wait [#allocation6], 1280  }
  0x37   :  { %495 = vsyncadd [#allocation6], 4294966016  ;;  %vm71_vm0 = vcmask 261120   ;;  %v69_v0 = vld [vmem:[#allocation2] sm:$0xff]  ;;  %v593_v1 = vld [vmem:[#allocation2 + $0x8] sm:$0xff]  ;;  %v505_v9 = vmov 0.0  }
  0x38   :  { %v72_v2 = vsel %vm71_vm0, %v69_v0, 0.0  ;;  %v78_v3 = vmul.f32 %v69_v0, %v69_v0  ;;  %v75_v4 = vsel %vm71_vm0, %v593_v1, 0.0  ;;  %v79_v5 = vmul.f32 %v593_v1, %v593_v1  ;;  %v390_v8 = vld [vmem:[#allocation5] sm:$0xff]   ;;  %352 = vmatprep.subr.bf16.mxu0 %v505_v9  ;;  %v391_v10 = vld [vmem:[#allocation5 + $0x8] sm:$0xff]   ;;  %360 = vmatprep.subr.bf16.mxu1 %v505_v9  ;;  %v392_v11 = vld [vmem:[#allocation7] sm:$0xff]   ;;  %s507_s21 = smov [#allocation8]  }
  0x39   :  { %73 = vadd.xlane.f32.xlu0 %v72_v2  ;;  %vm506_vm1 = vmmov 0   ;;  %353 = vmatpush3.bf16.msra.mxu0 %v390_v8  ;;  %v393_v12 = vld [vmem:[#allocation7 + $0x8] sm:$0xff]   ;;  %v394_v13 = vld [vmem:[#allocation7 + $0x10] sm:$0xff]   ;;  %v395_v14 = vld [vmem:[#allocation7 + $0x18] sm:$0xff]   ;;  %s312_s22 = sshll.u32 %s507_s21, 4  ;;  %s313_s22 = int_to_ptr.vmem [resolvable:$true] %s312_s22 }
  0x3a   :  { %v80_v6 = vsel %vm71_vm0, %v78_v3, 0.0  ;;  %v83_v7 = vsel %vm71_vm0, %v79_v5, 0.0  ;;  %356 = vmatprep.mubr.msk.bf16.mxu0 %vm506_vm1, %v505_v9  ;;  %354 = vmatprep.subr.bf16.mxu0 %v505_v9  ;;  %v396_v15 = vld [vmem:[#allocation7 + $0x20] sm:$0xff]   ;;  %v397_v16 = vld [vmem:[#allocation7 + $0x28] sm:$0xff]   ;;  %v398_v46 = vld [vmem:[#allocation7 + $0x30] sm:$0xff]   ;;  %p475_p11 = scmp.lt.s32.totalorder %s313_s22, %s313_s22 }
  0x3b   :  { %81 = vadd.xlane.f32.xlu1 %v80_v6  ;;  %376 = vmatprep.mubr.msk.bf16.mxu1 %vm506_vm1, %v505_v9  ;;  %v325_v36 = vld [vmem:[%s632_s1] ss:$0 sm:$0xff]  ;;  %v399_v47 = vld [vmem:[#allocation7 + $0x38] sm:$0xff]  }
  0x3c   :  { %361 = vmatpush3.bf16.msra.mxu1 %v392_v11  ;;  %v326_v41 = vld [vmem:[%s633_s2] ss:$0 sm:$0xff] }
  0x3d   :  { %76 = vadd.xlane.f32.xlu0 %v75_v4  ;;  %355 = vmatpush3.bf16.msra.mxu0 %v391_v10  ;;  %v327_v48 = vld [vmem:[%s635_s4] ss:$0 sm:$0xff]  ;;  %s470_s4 = scalar_lea.vmem %s313_s22, 256 }
  0x3e   :  { %362 = vmatprep.subr.bf16.mxu1 %v505_v9  ;;  %v331_v58 = vld [vmem:[%s637_s6] ss:$0 sm:$0xff]  ;;  %p471_p10 = scmp.ne.s32.totalorder %s313_s22, %s470_s4  ;;  %p476_p12 = scmp.lt.s32.totalorder %s470_s4, %s470_s4 }
  0x3f   :  { %84 = vadd.xlane.f32.xlu1 %v83_v7 }
  0x40   :  { %363 = vmatpush3.bf16.msra.mxu1 %v393_v12  ;;  %p477_p13 = por %p476_p12, %p475_p11 }
  0x41   :  { %364 = vmatprep.subr.bf16.mxu1 %v505_v9 }
  0x42   :  { %p478_p0 = pnand %p477_p13, %p471_p10 }
  0x44   :  { %365 = vmatpush3.bf16.msra.mxu1 %v394_v13 }
  0x45   :  { %366 = vmatprep.subr.bf16.mxu1 %v505_v9 }
  0x48   :  { %367 = vmatpush3.bf16.msra.mxu1 %v395_v14 }
  0x49   :  { %368 = vmatprep.subr.bf16.mxu1 %v505_v9 }
  0x4c   :  { %369 = vmatpush3.bf16.msra.mxu1 %v396_v15 }
  0x4d   :  { %370 = vmatprep.subr.bf16.mxu1 %v505_v9 }
  0x50   :  { %371 = vmatpush3.bf16.msra.mxu1 %v397_v16 }
  0x51   :  { %372 = vmatprep.subr.bf16.mxu1 %v505_v9 }
  0x54   :  { %373 = vmatpush3.bf16.msra.mxu1 %v398_v46 }
  0x55   :  { %374 = vmatprep.subr.bf16.mxu1 %v505_v9 }
  0x58   :  { %375 = vmatpush3.bf16.msra.mxu1 %v399_v47 }
  0xc6   :  { %v74_v17 = vpop.xlane.xlu0 %73 }
  0xc7   :  { %v86_v18 = vmul.f32 0.03125, %v74_v17 }
  0xc8   :  { %v82_v19 = vpop.xlane.xlu1 %81 }
  0xc9   :  { %v90_v20 = vmul.f32 %v86_v18, %v86_v18  ;;  %v88_v21 = vmul.f32 0.03125, %v82_v19  ;;  %v96_v33 = vsub.f32 %v69_v0, %v86_v18 }
  0xca   :  { %v77_v22 = vpop.xlane.xlu0 %76 }
  0xcb   :  { %v92_v23 = vsub.f32 %v88_v21, %v90_v20  ;;  %v87_v24 = vmul.f32 0.03125, %v77_v22 }
  0xcc   :  { %v85_v25 = vpop.xlane.xlu1 %84 }
  0xcd   :  { %v94_v26 = vmax.f32 %v92_v23, 0.0  ;;  %v91_v27 = vmul.f32 %v87_v24, %v87_v24  ;;  %v89_v28 = vmul.f32 0.03125, %v85_v25  ;;  %v97_v37 = vsub.f32 %v593_v1, %v87_v24 }
  0xcf   :  { %v98_v29 = vadd.f32 1e-05, %v94_v26  ;;  %v93_v30 = vsub.f32 %v89_v28, %v91_v27 }
  0xd1   :  { %400 = vrsqrt.f32 %v98_v29  ;;  %v95_v31 = vmax.f32 %v93_v30, 0.0 }
  0xd3   :  { %v99_v32 = vadd.f32 1e-05, %v95_v31 }
  0xd5   :  { %402 = vrsqrt.f32 %v99_v32 }
  0xdb   :  { %v401_v34 = vpop.eup %400 }
  0xdc   :  { %v102_v35 = vmul.f32 %v401_v34, %v96_v33 }
  0xde   :  { %v111_v40 = vmul.f32 %v325_v36, %v102_v35 }
  0xdf   :  { %v403_v38 = vpop.eup %402 }
  0xe0   :  { %v103_v39 = vmul.f32 %v403_v38, %v97_v37  ;;  %v120_v43 = vadd.f32 %v326_v41, %v111_v40 }
  0xe2   :  { %v112_v42 = vmul.f32 %v325_v36, %v103_v39 }
  0xe4   :  { %v121_v44 = vadd.f32 %v326_v41, %v112_v42 }
  0xe6   :  { %v122_v45 = vpack.c.bf16 %v121_v44, %v120_v43 }
  0xe8   :  { %357 = vmatmul.mubr.msk.bf16.vlgmr.msra.gmra.mrb[0].mxu0 %vm71_vm0, %v122_v45 }
 0x1bb   :  { %v183_v49 = vpop.f32.mrb[0].mxu0 }
 0x1bc   :  { %v184_v50 = vadd.f32 %v327_v48, %v183_v49  ;;  %v358_v51 = vpop.f32.mrb[1].mxu0 }
 0x1bd   :  { %v186_v52 = vpop.f32.mrb[2].mxu0 }
 0x1be   :  { %v187_v53 = vadd.f32 %v327_v48, %v186_v52  ;;  %v359_v54 = vpop.f32.mrb[3].mxu0  ;;  %v190_v55 = vmax.f32 %v184_v50, 0.0 }
 0x1c0   :  { %v191_v56 = vmax.f32 %v187_v53, 0.0 }
 0x1c2   :  { %v192_v57 = vpack.c.bf16 %v191_v56, %v190_v55 }
 0x1c4   :  { %377 = vmatmul.mubr.bf16.vlgmr.msra.gmra.mrb[0].mxu1 %v192_v57 }
 0x297   :  { %v298_v59 = vpop.f32.mrb[0].mxu1 }
 0x298   :  { %v299_v60 = vadd.f32 %v331_v58, %v298_v59  ;;  %v378_v61 = vpop.f32.mrb[1].mxu1 }
 0x299   :  { %v301_v62 = vpop.f32.mrb[2].mxu1 }
 0x29a   :  { %305 = vst [vmem:[#allocation8] sm:$0xff] %v299_v60  ;;  %v302_v63 = vadd.f32 %v331_v58, %v301_v62  ;;  %v379_v0 = vpop.f32.mrb[3].mxu1 }
 0x29c   :  { %306 = vst [vmem:[#allocation8 + $0x8] sm:$0xff] %v302_v63 }
 0x29d   :  { %481 = shalt.err (!%p478_p0)
}
 0x29e   :  { %s482_s24 = scalar_lea.hbm %s638_s7, 256 }
 0x29f   :  { %p483_p1 = scmp.ne.s32.totalorder %s638_s7, %s482_s24  ;;  %p486_p2 = scmp.lt.u32.totalorder %s482_s24, %s638_s7 }
 0x2a1   :  { %p488_p3 = pnand %p486_p2, %p483_p1 }
 0x2a3   :  { %491 = shalt.err (!%p488_p3)
}
 0x2a4   :  { %318 = dma.vmem_to_hbm [thread:$0]  %s313_s22, 256, %s638_s7, [#allocation4], %s502_s3, %s502_s3, %s503_s25  }
 0x2a5   :  { %496 = dma.done.wait [#allocation4], 256  }
 0x2a6   :  { %497 = vsyncadd [#allocation4], 4294967040 }
 0x2a7   :  { %322 = vsyncpa [#allocation3], 1 }
 0x2a8   :  { %323 = vsyncpa [#allocation6], 1 }
 0x2a9   :  { %324 = vsyncpa [#allocation4], 1 }

// kernel: tpu_custom_call.1
= control target key start
LH: loop header
LB: loop body
LE: loop exit
PB: predicated region body
PF: predicated region fallthrough
CT: control target
= control target key end

     0   :  { %12 = vsyncpa [#allocation3], 0  ;;  %s631_s0 = inlined_call_operand.hbm [shape: f32[16,32], index: 0, kind: input, shape index: {}]   ;;  %s632_s1 = inlined_call_operand.vmem [shape: f32[1,32], index: 1, kind: input, shape index: {}]   ;;  %s633_s2 = inlined_call_operand.vmem [shape: f32[1,32], index: 2, kind: input, shape index: {}]   ;;  %s634_s3 = inlined_call_operand.hbm [shape: bf16[32,128], index: 3, kind: input, shape index: {}]   ;;  %s635_s4 = inlined_call_operand.vmem [shape: f32[1,128], index: 4, kind: input, shape index: {}]   ;;  %s636_s5 = inlined_call_operand.hbm [shape: bf16[128,128], index: 5, kind: input, shape index: {}]   ;;  %s637_s6 = inlined_call_operand.vmem [shape: f32[1,128], index: 6, kind: input, shape index: {}]   ;;  %s638_s7 = inlined_call_operand.hbm [shape: f32[16,128], index: 7, kind: output, shape index: {}]  }
   0x1   :  { %13 = vsyncpa [#allocation6], 0 }
   0x2   :  { %14 = vsyncpa [#allocation4], 0  ;;  %s498_s24 = smov [#allocation5]   ;;  %s404_s28 = scalar_lea.hbm %s634_s3, 256 }
   0x3   :  { %s36_s25 = sshll.u32 %s498_s24, 4  ;;  %p405_p0 = scmp.ne.s32.totalorder %s634_s3, %s404_s28  ;;  %s37_s25 = int_to_ptr.vmem [resolvable:$true] %s36_s25 }
   0x4   :  { %p408_p1 = scmp.lt.u32.totalorder %s404_s28, %s634_s3 }
   0x6   :  { %p410_p2 = pnand %p408_p1, %p405_p0 }
   0x8   :  { %413 = shalt.err (!%p410_p2)
}
   0x9   :  { %s414_s10 = scalar_lea.vmem %s37_s25, 256  ;;  %p419_p4 = scmp.lt.s32.totalorder %s37_s25, %s37_s25 }
   0xa   :  { %p415_p3 = scmp.ne.s32.totalorder %s37_s25, %s414_s10  ;;  %p420_p5 = scmp.lt.s32.totalorder %s414_s10, %s414_s10 }
   0xc   :  { %p421_p6 = por %p420_p5, %p419_p4 }
   0xe   :  { %p422_p7 = pnand %p421_p6, %p415_p3 }
  0x10   :  { %425 = shalt.err (!%p422_p7)
}
  0x11   :  { %s499_s11 = smov 64   ;;  %s500_s12 = smov 4  }
  0x12   :  { %42 = dma.hbm_to_vmem [thread:$0]  %s634_s3, 256, %s37_s25, [#allocation6], %s499_s11, %s499_s11, %s500_s12  }
  0x13   :  { %s501_s15 = smov [#allocation2]   ;;  %s426_s19 = scalar_lea.hbm %s631_s0, 256 }
  0x14   :  { %s20_s16 = sshll.u32 %s501_s15, 4  ;;  %p427_p8 = scmp.ne.s32.totalorder %s631_s0, %s426_s19  ;;  %s21_s16 = int_to_ptr.vmem [resolvable:$true] %s20_s16 }
  0x15   :  { %p430_p9 = scmp.lt.u32.totalorder %s426_s19, %s631_s0 }
  0x17   :  { %p432_p10 = pnand %p430_p9, %p427_p8 }
  0x19   :  { %435 = shalt.err (!%p432_p10)
}
  0x1a   :  { %s436_s24 = scalar_lea.vmem %s21_s16, 256  ;;  %p441_p12 = scmp.lt.s32.totalorder %s21_s16, %s21_s16 }
  0x1b   :  { %p437_p11 = scmp.ne.s32.totalorder %s21_s16, %s436_s24  ;;  %p442_p13 = scmp.lt.s32.totalorder %s436_s24, %s436_s24 }
  0x1d   :  { %p443_p0 = por %p442_p13, %p441_p12 }
  0x1f   :  { %p444_p1 = pnand %p443_p0, %p437_p11 }
  0x21   :  { %447 = shalt.err (!%p444_p1)
}
  0x22   :  { %s502_s3 = smov 128   ;;  %s503_s25 = smov 8  }
  0x23   :  { %26 = dma.hbm_to_vmem [thread:$0]  %s631_s0, 256, %s21_s16, [#allocation3], %s502_s3, %s502_s3, %s503_s25  }
  0x24   :  { %s504_s28 = smov [#allocation7]   ;;  %s448_s9 = scalar_lea.hbm %s636_s5, 1024 }
  0x25   :  { %s50_s29 = sshll.u32 %s504_s28, 4  ;;  %p449_p2 = scmp.ne.s32.totalorder %s636_s5, %s448_s9  ;;  %s51_s29 = int_to_ptr.vmem [resolvable:$true] %s50_s29 }
  0x26   :  { %p452_p3 = scmp.lt.u32.totalorder %s448_s9, %s636_s5 }
  0x28   :  { %p454_p4 = pnand %p452_p3, %p449_p2 }
  0x2a   :  { %457 = shalt.err (!%p454_p4)
}
  0x2b   :  { %s458_s17 = scalar_lea.vmem %s51_s29, 1024  ;;  %p463_p6 = scmp.lt.s32.totalorder %s51_s29, %s51_s29 }
  0x2c   :  { %p459_p5 = scmp.ne.s32.totalorder %s51_s29, %s458_s17  ;;  %p464_p7 = scmp.lt.s32.totalorder %s458_s17, %s458_s17 }
  0x2e   :  { %p465_p8 = por %p464_p7, %p463_p6 }
  0x30   :  { %p466_p9 = pnand %p465_p8, %p459_p5 }
  0x32   :  { %469 = shalt.err (!%p466_p9)
}
  0x33   :  { %56 = dma.hbm_to_vmem [thread:$0]  %s636_s5, 1024, %s51_s29, [#allocation6], %s499_s11, %s499_s11, %s500_s12  }
  0x34   :  { %492 = dma.done.wait [#allocation3], 256  }
  0x35   :  { %493 = vsyncadd [#allocation3], 4294967040 }
  0x36   :  { %494 = dma.done.wait [#allocation6], 1280  }
  0x37   :  { %495 = vsyncadd [#allocation6], 4294966016  ;;  %vm71_vm0 = vcmask 261120   ;;  %v69_v0 = vld [vmem:[#allocation2] sm:$0xff]  ;;  %v593_v1 = vld [vmem:[#allocation2 + $0x8] sm:$0xff]  ;;  %v505_v9 = vmov 0.0  }
  0x38   :  { %v72_v2 = vsel %vm71_vm0, %v69_v0, 0.0  ;;  %v78_v3 = vmul.f32 %v69_v0, %v69_v0  ;;  %v75_v4 = vsel %vm71_vm0, %v593_v1, 0.0  ;;  %v79_v5 = vmul.f32 %v593_v1, %v593_v1  ;;  %v390_v8 = vld [vmem:[#allocation5] sm:$0xff]   ;;  %352 = vmatprep.subr.bf16.mxu0 %v505_v9  ;;  %v391_v10 = vld [vmem:[#allocation5 + $0x8] sm:$0xff]   ;;  %360 = vmatprep.subr.bf16.mxu1 %v505_v9  ;;  %v392_v11 = vld [vmem:[#allocation7] sm:$0xff]   ;;  %s507_s21 = smov [#allocation8]  }
  0x39   :  { %73 = vadd.xlane.f32.xlu0 %v72_v2  ;;  %vm506_vm1 = vmmov 0   ;;  %353 = vmatpush3.bf16.msra.mxu0 %v390_v8  ;;  %v393_v12 = vld [vmem:[#allocation7 + $0x8] sm:$0xff]   ;;  %v394_v13 = vld [vmem:[#allocation7 + $0x10] sm:$0xff]   ;;  %v395_v14 = vld [vmem:[#allocation7 + $0x18] sm:$0xff]   ;;  %s312_s22 = sshll.u32 %s507_s21, 4  ;;  %s313_s22 = int_to_ptr.vmem [resolvable:$true] %s312_s22 }
  0x3a   :  { %v80_v6 = vsel %vm71_vm0, %v78_v3, 0.0  ;;  %v83_v7 = vsel %vm71_vm0, %v79_v5, 0.0  ;;  %356 = vmatprep.mubr.msk.bf16.mxu0 %vm506_vm1, %v505_v9  ;;  %354 = vmatprep.subr.bf16.mxu0 %v505_v9  ;;  %v396_v15 = vld [vmem:[#allocation7 + $0x20] sm:$0xff]   ;;  %v397_v16 = vld [vmem:[#allocation7 + $0x28] sm:$0xff]   ;;  %v398_v46 = vld [vmem:[#allocation7 + $0x30] sm:$0xff]   ;;  %p475_p11 = scmp.lt.s32.totalorder %s313_s22, %s313_s22 }
  0x3b   :  { %81 = vadd.xlane.f32.xlu1 %v80_v6  ;;  %376 = vmatprep.mubr.msk.bf16.mxu1 %vm506_vm1, %v505_v9  ;;  %v325_v36 = vld [vmem:[%s632_s1] ss:$0 sm:$0xff]  ;;  %v399_v47 = vld [vmem:[#allocation7 + $0x38] sm:$0xff]  }
  0x3c   :  { %361 = vmatpush3.bf16.msra.mxu1 %v392_v11  ;;  %v326_v41 = vld [vmem:[%s633_s2] ss:$0 sm:$0xff] }
  0x3d   :  { %76 = vadd.xlane.f32.xlu0 %v75_v4  ;;  %355 = vmatpush3.bf16.msra.mxu0 %v391_v10  ;;  %v327_v48 = vld [vmem:[%s635_s4] ss:$0 sm:$0xff]  ;;  %s470_s4 = scalar_lea.vmem %s313_s22, 256 }
  0x3e   :  { %362 = vmatprep.subr.bf16.mxu1 %v505_v9  ;;  %v331_v58 = vld [vmem:[%s637_s6] ss:$0 sm:$0xff]  ;;  %p471_p10 = scmp.ne.s32.totalorder %s313_s22, %s470_s4  ;;  %p476_p12 = scmp.lt.s32.totalorder %s470_s4, %s470_s4 }
  0x3f   :  { %84 = vadd.xlane.f32.xlu1 %v83_v7 }
  0x40   :  { %363 = vmatpush3.bf16.msra.mxu1 %v393_v12  ;;  %p477_p13 = por %p476_p12, %p475_p11 }
  0x41   :  { %364 = vmatprep.subr.bf16.mxu1 %v505_v9 }
  0x42   :  { %p478_p0 = pnand %p477_p13, %p471_p10 }
  0x44   :  { %365 = vmatpush3.bf16.msra.mxu1 %v394_v13 }
  0x45   :  { %366 = vmatprep.subr.bf16.mxu1 %v505_v9 }
  0x48   :  { %367 = vmatpush3.bf16.msra.mxu1 %v395_v14 }
  0x49   :  { %368 = vmatprep.subr.bf16.mxu1 %v505_v9 }
  0x4c   :  { %369 = vmatpush3.bf16.msra.mxu1 %v396_v15 }
  0x4d   :  { %370 = vmatprep.subr.bf16.mxu1 %v505_v9 }
  0x50   :  { %371 = vmatpush3.bf16.msra.mxu1 %v397_v16 }
  0x51   :  { %372 = vmatprep.subr.bf16.mxu1 %v505_v9 }
  0x54   :  { %373 = vmatpush3.bf16.msra.mxu1 %v398_v46 }
  0x55   :  { %374 = vmatprep.subr.bf16.mxu1 %v505_v9 }
  0x58   :  { %375 = vmatpush3.bf16.msra.mxu1 %v399_v47 }
  0xc6   :  { %v74_v17 = vpop.xlane.xlu0 %73 }
  0xc7   :  { %v86_v18 = vmul.f32 0.03125, %v74_v17 }
  0xc8   :  { %v82_v19 = vpop.xlane.xlu1 %81 }
  0xc9   :  { %v90_v20 = vmul.f32 %v86_v18, %v86_v18  ;;  %v88_v21 = vmul.f32 0.03125, %v82_v19  ;;  %v96_v33 = vsub.f32 %v69_v0, %v86_v18 }
  0xca   :  { %v77_v22 = vpop.xlane.xlu0 %76 }
  0xcb   :  { %v92_v23 = vsub.f32 %v88_v21, %v90_v20  ;;  %v87_v24 = vmul.f32 0.03125, %v77_v22 }
  0xcc   :  { %v85_v25 = vpop.xlane.xlu1 %84 }
  0xcd   :  { %v94_v26 = vmax.f32 %v92_v23, 0.0  ;;  %v91_v27 = vmul.f32 %v87_v24, %v87_v24  ;;  %v89_v28 = vmul.f32 0.03125, %v85_v25  ;;  %v97_v37 = vsub.f32 %v593_v1, %v87_v24 }
  0xcf   :  { %v98_v29 = vadd.f32 1e-05, %v94_v26  ;;  %v93_v30 = vsub.f32 %v89_v28, %v91_v27 }
  0xd1   :  { %400 = vrsqrt.f32 %v98_v29  ;;  %v95_v31 = vmax.f32 %v93_v30, 0.0 }
  0xd3   :  { %v99_v32 = vadd.f32 1e-05, %v95_v31 }
  0xd5   :  { %402 = vrsqrt.f32 %v99_v32 }
  0xdb   :  { %v401_v34 = vpop.eup %400 }
  0xdc   :  { %v102_v35 = vmul.f32 %v401_v34, %v96_v33 }
  0xde   :  { %v111_v40 = vmul.f32 %v325_v36, %v102_v35 }
  0xdf   :  { %v403_v38 = vpop.eup %402 }
  0xe0   :  { %v103_v39 = vmul.f32 %v403_v38, %v97_v37  ;;  %v120_v43 = vadd.f32 %v326_v41, %v111_v40 }
  0xe2   :  { %v112_v42 = vmul.f32 %v325_v36, %v103_v39 }
  0xe4   :  { %v121_v44 = vadd.f32 %v326_v41, %v112_v42 }
  0xe6   :  { %v122_v45 = vpack.c.bf16 %v121_v44, %v120_v43 }
  0xe8   :  { %357 = vmatmul.mubr.msk.bf16.vlgmr.msra.gmra.mrb[0].mxu0 %vm71_vm0, %v122_v45 }
 0x1bb   :  { %v183_v49 = vpop.f32.mrb[0].mxu0 }
 0x1bc   :  { %v184_v50 = vadd.f32 %v327_v48, %v183_v49  ;;  %v358_v51 = vpop.f32.mrb[1].mxu0 }
 0x1bd   :  { %v186_v52 = vpop.f32.mrb[2].mxu0 }
 0x1be   :  { %v187_v53 = vadd.f32 %v327_v48, %v186_v52  ;;  %v359_v54 = vpop.f32.mrb[3].mxu0  ;;  %v190_v55 = vmax.f32 %v184_v50, 0.0 }
 0x1c0   :  { %v191_v56 = vmax.f32 %v187_v53, 0.0 }
 0x1c2   :  { %v192_v57 = vpack.c.bf16 %v191_v56, %v190_v55 }
 0x1c4   :  { %377 = vmatmul.mubr.bf16.vlgmr.msra.gmra.mrb[0].mxu1 %v192_v57 }
 0x297   :  { %v298_v59 = vpop.f32.mrb[0].mxu1 }
 0x298   :  { %v299_v60 = vadd.f32 %v331_v58, %v298_v59  ;;  %v378_v61 = vpop.f32.mrb[1].mxu1 }
 0x299   :  { %v301_v62 = vpop.f32.mrb[2].mxu1 }
 0x29a   :  { %305 = vst [vmem:[#allocation8] sm:$0xff] %v299_v60  ;;  %v302_v63 = vadd.f32 %v331_v58, %v301_v62  ;;  %v379_v0 = vpop.f32.mrb[3].mxu1 }
 0x29c   :  { %306 = vst [vmem:[#allocation8 + $0x8] sm:$0xff] %v302_v63 }
 0x29d   :  { %481 = shalt.err (!%p478_p0)
}
 0x29e   :  { %s482_s24 = scalar_lea.hbm %s638_s7, 256 }
 0x29f   :  { %p483_p1 = scmp.ne.s32.totalorder %s638_s7, %s482_s24  ;;  %p486_p2 = scmp.lt.u32.totalorder %s482_s24, %s638_s7 }
 0x2a1   :  { %p488_p3 = pnand %p486_p2, %p483_p1 }
 0x2a3   :  { %491 = shalt.err (!%p488_p3)
}
 0x2a4   :  { %318 = dma.vmem_to_hbm [thread:$0]  %s313_s22, 256, %s638_s7, [#allocation4], %s502_s3, %s502_s3, %s503_s25  }
 0x2a5   :  { %496 = dma.done.wait [#allocation4], 256  }
 0x2a6   :  { %497 = vsyncadd [#allocation4], 4294967040 }
 0x2a7   :  { %322 = vsyncpa [#allocation3], 1 }
 0x2a8   :  { %323 = vsyncpa [#allocation6], 1 }
 0x2a9   :  { %324 = vsyncpa [#allocation4], 1 }

</bundles_post_ra>
